<compile_context>
chip_gen: v5e
topology: v5e:2x2
jax: 0.10.0
libtpu: 0.0.40
codegen_flags: <defaults>
</compile_context>

<pallas_src>
import functools
import math

import jax
import jax.numpy as jnp
from jax.experimental import pallas as pl
from jax.experimental.pallas import tpu as pltpu


def _round_up(v, m):
    return ((v + m - 1) // m) * m


def _spec_amp_kernel(fx_ref, fh_ref, basis_ref, out_ref, *, power, f_pad,
                     reduce_in_kernel):
    basis = basis_ref[...]                      # (K, 2*F_pad)  [s*cos | s*sin]

    # Real DFT of both signals: one MXU matmul each (bf16 in, f32 accumulate).
    zx = jnp.dot(fx_ref[...], basis, preferred_element_type=jnp.float32)
    zh = jnp.dot(fh_ref[...], basis, preferred_element_type=jnp.float32)

    re_x, im_x = zx[:, :f_pad], zx[:, f_pad:]
    re_h, im_h = zh[:, :f_pad], zh[:, f_pad:]

    a = re_x * re_x + im_x * im_x               # |X|^2 (scale folded into basis)
    b = re_h * re_h + im_h * im_h               # |H|^2
    if power == 2.0:
        # (|X| - |H|)^2 == a + b - 2*sqrt(a*b): one EUP sqrt instead of two.
        p = a + b - 2.0 * jnp.sqrt(a * b)
    else:
        d = jnp.abs(jnp.sqrt(a) - jnp.sqrt(b))
        p = d if power == 1.0 else d ** power   # generic power hits EUP exp/log

    if reduce_in_kernel:
        # Per-tile partial sum over frame rows (sublane axis), kept lane-dense;
        # padded frequency lanes / padded frames are exactly zero.  The 128-lane
        # fold + final sum happens in the tiny JAX epilogue.
        out_ref[...] = jnp.sum(p, axis=0).reshape(1, 1, f_pad)
    else:
        # Per-frame frequency sum (torch dim=1), written lane-dense as (1,1,TM).
        tm = p.shape[0]
        out_ref[...] = jnp.sum(p, axis=1).reshape(1, 1, tm)


def spec_amp_loss(x, x_hat, *, field, stride, power=2.0, window='ones',
                  reduction='mean', tm=512, compute_dtype=jnp.bfloat16):
    """JAX/Pallas equivalent of SpecAmpLoss.forward (window_fn=torch.ones)."""
    assert window == 'ones'  # TODO(synk): other torch window fns not needed here
    B, T = x.shape
    n_frames = (T - field) // stride + 1
    F = field // 2 + 1
    F_pad = _round_up(F, 128)                   # lane-dense frequency axis
    M = B * n_frames

    # Pad the contraction dim K to an MXU-friendly multiple when field is large
    # and ragged (zero frame columns x zero basis rows are numerically exact).
    K = _round_up(field, 128) if field >= 128 else field

    # Per-generation tuning: generous VMEM + big tiles on v5e/v6e (128 MiB),
    # tighter VMEM and >=2 tiles (feed both TensorCores) on v7x (64 MiB/TC).
    try:
        kind = jax.devices()[0].device_kind.lower()
    except Exception:
        kind = ''
    is_v7 = 'v7' in kind
    vmem_limit = (44 if is_v7 else 96) * 1024 * 1024
    min_tiles = 2 if is_v7 else 1

    # Tile over M.  bf16 frame blocks need a sublane multiple of 16 (f32: 8).
    itemsize = jnp.dtype(compute_dtype).itemsize
    m_align = {4: 8, 2: 16, 1: 32}.get(itemsize, 8)
    TM = max(m_align, min(_round_up(tm, m_align), _round_up(M, m_align)))
    if min_tiles > 1:
        TM = min(TM, max(m_align, _round_up(-(-M // min_tiles), m_align)))
    num_tiles = -(-M // TM)
    M_pad = num_tiles * TM

    # --- glue: framing (center=False) ----------------------------------------
    # TODO(synk): stream raw (B, T) audio per M-tile (memory_space=pl.ANY +
    # manual make_async_copy of the contiguous span, strided framing in-kernel)
    # to avoid the ~field/stride HBM amplification of materialised frames.
    idx = jnp.arange(n_frames)[:, None] * stride + jnp.arange(field)[None, :]
    frames_x = x[:, idx].reshape(M, field).astype(compute_dtype)
    frames_h = x_hat[:, idx].reshape(M, field).astype(compute_dtype)
    if M_pad != M or K != field:
        pad = ((0, M_pad - M), (0, K - field))
        frames_x = jnp.pad(frames_x, pad)       # zero frames/cols contribute 0
        frames_h = jnp.pad(frames_h, pad)
    # TODO(synk): optionally stack both signals into one (2*TM, K) LHS per tile
    # so the basis RHS is pushed into the MXU once per tile (minor; measure).

    # --- glue: fused, scale-folded DFT basis [scale*cos | scale*sin] ----------
    tt = jnp.arange(field, dtype=jnp.float32)[:, None]
    ff = jnp.arange(F, dtype=jnp.float32)[None, :]
    ang = 2.0 * jnp.pi * tt * ff / float(field)
    scale = jnp.full((F,), math.sqrt(2.0), dtype=jnp.float32)
    scale = scale.at[0].set(1.0)
    if field % 2 == 0:
        scale = scale.at[field // 2].set(1.0)
    # Spectrogram(normalized=True, window=ones): divide STFT by sqrt(sum(win^2))
    scale = scale / math.sqrt(float(field))
    cos_b = jnp.cos(ang) * scale[None, :]
    sin_b = jnp.sin(ang) * scale[None, :]       # sign irrelevant under |.|
    basis = jnp.zeros((K, 2 * F_pad), dtype=jnp.float32)
    basis = basis.at[:field, :F].set(cos_b)
    basis = basis.at[:field, F_pad:F_pad + F].set(sin_b)
    basis = basis.astype(compute_dtype)
    # TODO(synk): if bf16 basis precision ever limits accuracy, split into a
    # hi/lo bf16 pair and accumulate two matmuls.

    reduce_in_kernel = reduction in ('mean', 'sum')
    kernel = functools.partial(_spec_amp_kernel, power=float(power),
                               f_pad=F_pad, reduce_in_kernel=reduce_in_kernel)

    frame_specs = [
        pl.BlockSpec((TM, K), lambda i: (i, 0)),
        pl.BlockSpec((TM, K), lambda i: (i, 0)),
    ]
    if reduce_in_kernel:
        out_shape = jax.ShapeDtypeStruct((num_tiles, 1, F_pad), jnp.float32)
        out_specs = pl.BlockSpec((1, 1, F_pad), lambda i: (i, 0, 0))
    else:
        out_shape = jax.ShapeDtypeStruct((num_tiles, 1, TM), jnp.float32)
        out_specs = pl.BlockSpec((1, 1, TM), lambda i: (i, 0, 0))

    def _run(basis_spec):
        return pl.pallas_call(
            kernel,
            out_shape=out_shape,
            grid=(num_tiles,),
            in_specs=frame_specs + [basis_spec],
            out_specs=out_specs,
            compiler_params=pltpu.CompilerParams(
                dimension_semantics=("parallel",),
                vmem_limit_bytes=vmem_limit),
        )(frames_x, frames_h, basis)

    try:
        # Constant index_map -> basis DMA'd once; Buffered(1) also drops the
        # second (dead) VMEM buffer, which matters at field>=2048 on v7x.
        out = _run(pl.BlockSpec((K, 2 * F_pad), lambda i: (0, 0),
                                pipeline_mode=pl.Buffered(1)))
    except Exception:
        # Compatibility fallback: default (double-buffered) basis spec.
        out = _run(pl.BlockSpec((K, 2 * F_pad), lambda i: (0, 0)))

    if reduction == 'mean':
        return jnp.sum(out) / float(M)
    if reduction == 'sum':
        return jnp.sum(out)
    return out.reshape(M_pad)[:M].reshape(B, n_frames)


def _reference(x, x_hat, *, field, stride, power=2.0, reduction='mean'):
    """Pure-JAX reference (rfft) mirroring torchaudio Spectrogram semantics."""
    B, T = x.shape
    n_frames = (T - field) // stride + 1
    F = field // 2 + 1
    idx = jnp.arange(n_frames)[:, None] * stride + jnp.arange(field)[None, :]
    scale = jnp.full((F,), math.sqrt(2.0)).at[0].set(1.0)
    if field % 2 == 0:
        scale = scale.at[field // 2].set(1.0)

    def spec(sig):
        fr = sig[:, idx]                                 # (B, N, field)
        sp = jnp.abs(jnp.fft.rfft(fr, axis=-1)) / math.sqrt(float(field))
        return sp * scale[None, None, :]                 # (B, N, F)

    d = jnp.abs(spec(x) - spec(x_hat)) ** power
    loss = jnp.sum(d, axis=-1)                           # (B, N)
    if reduction == 'mean':
        return loss.mean()
    if reduction == 'sum':
        return loss.sum()
    return loss


if __name__ == "__main__":
    field, stride = 16, 4
    B, T = 2, 64
    n_frames = (T - field) // stride + 1

    key = jax.random.PRNGKey(0)
    k1, k2 = jax.random.split(key)
    x = jax.random.normal(k1, (B, T), dtype=jnp.float32)
    x_hat = x + 0.1 * jax.random.normal(k2, (B, T), dtype=jnp.float32)

    ref_mean = _reference(x, x_hat, field=field, stride=stride, power=2.0,
                          reduction='mean')
    ref_none = _reference(x, x_hat, field=field, stride=stride, power=2.0,
                          reduction='none')
    ref_p1 = _reference(x, x_hat, field=field, stride=stride, power=1.0,
                        reduction='mean')

    # f32 path: validates kernel math tightly (power==2 fast path, reduce path).
    out_f32 = jax.block_until_ready(
        spec_amp_loss(x, x_hat, field=field, stride=stride, power=2.0,
                      reduction='mean', compute_dtype=jnp.float32))
    assert jnp.allclose(out_f32, ref_mean, rtol=2e-3, atol=2e-4), (out_f32, ref_mean)

    # f32, forced multi-tile (exercises M padding + parallel grid axis).
    out_mt = jax.block_until_ready(
        spec_amp_loss(x, x_hat, field=field, stride=stride, power=2.0,
                      reduction='mean', tm=8, compute_dtype=jnp.float32))
    assert jnp.allclose(out_mt, ref_mean, rtol=2e-3, atol=2e-4), (out_mt, ref_mean)

    # f32, per-frame ('none') lane-dense output path.
    out_none = jax.block_until_ready(
        spec_amp_loss(x, x_hat, field=field, stride=stride, power=2.0,
                      reduction='none', compute_dtype=jnp.float32))
    assert out_none.shape == (B, n_frames)
    assert jnp.allclose(out_none, ref_none, rtol=2e-3, atol=2e-4)

    # f32, power=1 (generic magnitude path).
    out_p1 = jax.block_until_ready(
        spec_amp_loss(x, x_hat, field=field, stride=stride, power=1.0,
                      reduction='mean', compute_dtype=jnp.float32))
    assert jnp.allclose(out_p1, ref_p1, rtol=2e-3, atol=2e-4), (out_p1, ref_p1)

    # Default bf16 MXU-input path (f32 accumulation): looser tolerance.
    out_bf16 = jax.block_until_ready(
        spec_amp_loss(x, x_hat, field=field, stride=stride, power=2.0,
                      reduction='mean'))
    assert jnp.allclose(out_bf16, ref_mean, rtol=7e-2, atol=2e-3), (out_bf16, ref_mean)

    print("KERNEL_OK")
</pallas_src>

<mosaic_0001>
module attributes {stable_mosaic.version = 11 : i64} {
  func.func @_spec_amp_kernel(%arg0: i32, %arg1: memref<32x16xf32, #tpu.memory_space<vmem>>, %arg2: memref<32x16xf32, #tpu.memory_space<vmem>>, %arg3: memref<16x256xf32, #tpu.memory_space<vmem>>, %arg4: memref<1x1x128xf32, #tpu.memory_space<vmem>>) attributes {dimension_semantics = [#tpu.dimension_semantics<parallel>], iteration_bounds = array<i64: 1>, scalar_prefetch = 0 : i64, scratch_operands = 0 : i64, tpu.core_type = #tpu.core_type<tc>, window_params = [{transform_indices = @transform_0, window_bounds = array<i64: 32, 16>}, {transform_indices = @transform_1, window_bounds = array<i64: 32, 16>}, {pipeline_mode = #tpu.pipeline_mode<synchronous>, transform_indices = @transform_2, window_bounds = array<i64: 16, 256>}, {transform_indices = @transform_3, window_bounds = array<i64: 1, 1, 128>}]} {
    %c0 = arith.constant 0 : index
    %c0_0 = arith.constant 0 : index
    %0 = vector.load %arg3[%c0, %c0_0] : memref<16x256xf32, #tpu.memory_space<vmem>>, vector<16x256xf32>
    %c0_1 = arith.constant 0 : index
    %c0_2 = arith.constant 0 : index
    %1 = vector.load %arg1[%c0_1, %c0_2] : memref<32x16xf32, #tpu.memory_space<vmem>>, vector<32x16xf32>
    %cst = arith.constant dense<0.000000e+00> : vector<32x256xf32>
    %2 = tpu.matmul %1, %0, %cst {dimension_numbers = #tpu.dot_dimension_numbers<[1], [0], [0], [1], [0, 0, 1, 1], [], []>} : vector<32x16xf32>, vector<16x256xf32>, vector<32x256xf32> -> vector<32x256xf32>
    %c0_3 = arith.constant 0 : index
    %c0_4 = arith.constant 0 : index
    %3 = vector.load %arg2[%c0_3, %c0_4] : memref<32x16xf32, #tpu.memory_space<vmem>>, vector<32x16xf32>
    %cst_5 = arith.constant dense<0.000000e+00> : vector<32x256xf32>
    %4 = tpu.matmul %3, %0, %cst_5 {dimension_numbers = #tpu.dot_dimension_numbers<[1], [0], [0], [1], [0, 0, 1, 1], [], []>} : vector<32x16xf32>, vector<16x256xf32>, vector<32x256xf32> -> vector<32x256xf32>
    %5 = vector.extract_strided_slice %2 {offsets = [0, 0], sizes = [32, 128], strides = [1, 1]} : vector<32x256xf32> to vector<32x128xf32>
    %6 = vector.extract_strided_slice %2 {offsets = [0, 128], sizes = [32, 128], strides = [1, 1]} : vector<32x256xf32> to vector<32x128xf32>
    %7 = vector.extract_strided_slice %4 {offsets = [0, 0], sizes = [32, 128], strides = [1, 1]} : vector<32x256xf32> to vector<32x128xf32>
    %8 = vector.extract_strided_slice %4 {offsets = [0, 128], sizes = [32, 128], strides = [1, 1]} : vector<32x256xf32> to vector<32x128xf32>
    %9 = arith.mulf %5, %5 : vector<32x128xf32>
    %10 = arith.mulf %6, %6 : vector<32x128xf32>
    %11 = arith.addf %9, %10 : vector<32x128xf32>
    %12 = arith.mulf %7, %7 : vector<32x128xf32>
    %13 = arith.mulf %8, %8 : vector<32x128xf32>
    %14 = arith.addf %12, %13 : vector<32x128xf32>
    %15 = arith.addf %11, %14 : vector<32x128xf32>
    %16 = arith.mulf %11, %14 : vector<32x128xf32>
    %17 = math.sqrt %16 : vector<32x128xf32>
    %cst_6 = arith.constant 2.000000e+00 : f32
    %18 = vector.broadcast %cst_6 : f32 to vector<32x128xf32>
    %19 = arith.mulf %18, %17 : vector<32x128xf32>
    %20 = arith.subf %15, %19 : vector<32x128xf32>
    %cst_7 = arith.constant dense<0.000000e+00> : vector<128xf32>
    %21 = vector.multi_reduction <add>, %20, %cst_7 [0] : vector<32x128xf32> to vector<128xf32>
    %22 = vector.shape_cast %21 : vector<128xf32> to vector<1x1x128xf32>
    %c0_8 = arith.constant 0 : index
    %c0_9 = arith.constant 0 : index
    %c0_10 = arith.constant 0 : index
    %23 = vector.load %arg4[%c0_8, %c0_9, %c0_10] : memref<1x1x128xf32, #tpu.memory_space<vmem>>, vector<1x1x128xf32>
    tpu.vector_store %arg4[%c0_8, %c0_9, %c0_10], %22 {strides = array<i32>} : memref<1x1x128xf32, #tpu.memory_space<vmem>>, vector<1x1x128xf32>,
    return
  }
  func.func @transform_0(%arg0: i32) -> (i32, i32) {
    %c0_i32 = arith.constant 0 : i32
    %c0_i32_0 = arith.constant 0 : i32
    return %arg0, %c0_i32 : i32, i32
  }
  func.func @transform_1(%arg0: i32) -> (i32, i32) {
    %c0_i32 = arith.constant 0 : i32
    %c0_i32_0 = arith.constant 0 : i32
    return %arg0, %c0_i32 : i32, i32
  }
  func.func @transform_2(%arg0: i32) -> (i32, i32) {
    %c0_i32 = arith.constant 0 : i32
    %c0_i32_0 = arith.constant 0 : i32
    %c0_i32_1 = arith.constant 0 : i32
    return %c0_i32, %c0_i32_0 : i32, i32
  }
  func.func @transform_3(%arg0: i32) -> (i32, i32, i32) {
    %c0_i32 = arith.constant 0 : i32
    %c0_i32_0 = arith.constant 0 : i32
    %c0_i32_1 = arith.constant 0 : i32
    return %arg0, %c0_i32, %c0_i32_0 : i32, i32, i32
  }
}

module attributes {stable_mosaic.version = 11 : i64} {
  func.func @_spec_amp_kernel(%arg0: i32, %arg1: memref<32x16xf32, #tpu.memory_space<vmem>>, %arg2: memref<32x16xf32, #tpu.memory_space<vmem>>, %arg3: memref<16x256xf32, #tpu.memory_space<vmem>>, %arg4: memref<1x1x128xf32, #tpu.memory_space<vmem>>) attributes {dimension_semantics = [#tpu.dimension_semantics<parallel>], iteration_bounds = array<i64: 1>, scalar_prefetch = 0 : i64, scratch_operands = 0 : i64, tpu.core_type = #tpu.core_type<tc>, window_params = [{transform_indices = @transform_0, window_bounds = array<i64: 32, 16>}, {transform_indices = @transform_1, window_bounds = array<i64: 32, 16>}, {pipeline_mode = #tpu.pipeline_mode<synchronous>, transform_indices = @transform_2, window_bounds = array<i64: 16, 256>}, {transform_indices = @transform_3, window_bounds = array<i64: 1, 1, 128>}]} {
    %c0 = arith.constant 0 : index
    %c0_0 = arith.constant 0 : index
    %0 = vector.load %arg3[%c0, %c0_0] : memref<16x256xf32, #tpu.memory_space<vmem>>, vector<16x256xf32>
    %c0_1 = arith.constant 0 : index
    %c0_2 = arith.constant 0 : index
    %1 = vector.load %arg1[%c0_1, %c0_2] : memref<32x16xf32, #tpu.memory_space<vmem>>, vector<32x16xf32>
    %cst = arith.constant dense<0.000000e+00> : vector<32x256xf32>
    %2 = tpu.matmul %1, %0, %cst {dimension_numbers = #tpu.dot_dimension_numbers<[1], [0], [0], [1], [0, 0, 1, 1], [], []>} : vector<32x16xf32>, vector<16x256xf32>, vector<32x256xf32> -> vector<32x256xf32>
    %c0_3 = arith.constant 0 : index
    %c0_4 = arith.constant 0 : index
    %3 = vector.load %arg2[%c0_3, %c0_4] : memref<32x16xf32, #tpu.memory_space<vmem>>, vector<32x16xf32>
    %cst_5 = arith.constant dense<0.000000e+00> : vector<32x256xf32>
    %4 = tpu.matmul %3, %0, %cst_5 {dimension_numbers = #tpu.dot_dimension_numbers<[1], [0], [0], [1], [0, 0, 1, 1], [], []>} : vector<32x16xf32>, vector<16x256xf32>, vector<32x256xf32> -> vector<32x256xf32>
    %5 = vector.extract_strided_slice %2 {offsets = [0, 0], sizes = [32, 128], strides = [1, 1]} : vector<32x256xf32> to vector<32x128xf32>
    %6 = vector.extract_strided_slice %2 {offsets = [0, 128], sizes = [32, 128], strides = [1, 1]} : vector<32x256xf32> to vector<32x128xf32>
    %7 = vector.extract_strided_slice %4 {offsets = [0, 0], sizes = [32, 128], strides = [1, 1]} : vector<32x256xf32> to vector<32x128xf32>
    %8 = vector.extract_strided_slice %4 {offsets = [0, 128], sizes = [32, 128], strides = [1, 1]} : vector<32x256xf32> to vector<32x128xf32>
    %9 = arith.mulf %5, %5 : vector<32x128xf32>
    %10 = arith.mulf %6, %6 : vector<32x128xf32>
    %11 = arith.addf %9, %10 : vector<32x128xf32>
    %12 = arith.mulf %7, %7 : vector<32x128xf32>
    %13 = arith.mulf %8, %8 : vector<32x128xf32>
    %14 = arith.addf %12, %13 : vector<32x128xf32>
    %15 = arith.addf %11, %14 : vector<32x128xf32>
    %16 = arith.mulf %11, %14 : vector<32x128xf32>
    %17 = math.sqrt %16 : vector<32x128xf32>
    %cst_6 = arith.constant 2.000000e+00 : f32
    %18 = vector.broadcast %cst_6 : f32 to vector<32x128xf32>
    %19 = arith.mulf %18, %17 : vector<32x128xf32>
    %20 = arith.subf %15, %19 : vector<32x128xf32>
    %cst_7 = arith.constant dense<0.000000e+00> : vector<128xf32>
    %21 = vector.multi_reduction <add>, %20, %cst_7 [0] : vector<32x128xf32> to vector<128xf32>
    %22 = vector.shape_cast %21 : vector<128xf32> to vector<1x1x128xf32>
    %c0_8 = arith.constant 0 : index
    %c0_9 = arith.constant 0 : index
    %c0_10 = arith.constant 0 : index
    %23 = vector.load %arg4[%c0_8, %c0_9, %c0_10] : memref<1x1x128xf32, #tpu.memory_space<vmem>>, vector<1x1x128xf32>
    tpu.vector_store %arg4[%c0_8, %c0_9, %c0_10], %22 {strides = array<i32>} : memref<1x1x128xf32, #tpu.memory_space<vmem>>, vector<1x1x128xf32>,
    return
  }
  func.func @transform_0(%arg0: i32) -> (i32, i32) {
    %c0_i32 = arith.constant 0 : i32
    %c0_i32_0 = arith.constant 0 : i32
    return %arg0, %c0_i32 : i32, i32
  }
  func.func @transform_1(%arg0: i32) -> (i32, i32) {
    %c0_i32 = arith.constant 0 : i32
    %c0_i32_0 = arith.constant 0 : i32
    return %arg0, %c0_i32 : i32, i32
  }
  func.func @transform_2(%arg0: i32) -> (i32, i32) {
    %c0_i32 = arith.constant 0 : i32
    %c0_i32_0 = arith.constant 0 : i32
    %c0_i32_1 = arith.constant 0 : i32
    return %c0_i32, %c0_i32_0 : i32, i32
  }
  func.func @transform_3(%arg0: i32) -> (i32, i32, i32) {
    %c0_i32 = arith.constant 0 : i32
    %c0_i32_0 = arith.constant 0 : i32
    %c0_i32_1 = arith.constant 0 : i32
    return %arg0, %c0_i32, %c0_i32_0 : i32, i32, i32
  }
}

</mosaic_0001>

<bundles_post_ra>
// kernel: tpu_custom_call.1
= control target key start
LH: loop header
LB: loop body
LE: loop exit
PB: predicated region body
PF: predicated region fallthrough
CT: control target
= control target key end

     0   :  { %vm23_vm0 = vcmask 130048   ;;  %s438_s0 = inlined_call_operand.vmem [shape: f32[32,16], index: 0, kind: input, shape index: {}]   ;;  %s439_s1 = inlined_call_operand.vmem [shape: f32[32,16], index: 1, kind: input, shape index: {}]   ;;  %s440_s2 = inlined_call_operand.vmem [shape: f32[16,256], index: 2, kind: input, shape index: {}]   ;;  %s441_s3 = inlined_call_operand.hbm [shape: f32[1,1,128], index: 3, kind: output, shape index: {}]  }
   0x1   :  { %v17_v0 = vld [vmem:[%s440_s2 + $0x10] sm:$0xff]  ;;  %v18_v1 = vld [vmem:[%s440_s2 + $0x18] sm:$0xff]  ;;  %v15_v2 = vld [vmem:[%s440_s2] sm:$0xff] }
   0x2   :  { %124 = vmatpush.msra.mxu2 %v17_v0  ;;  %153 = vmatpush.msra.mxu3 %v18_v1  ;;  %v16_v3 = vld [vmem:[%s440_s2 + $0x8] sm:$0xff]  ;;  %v94_v4 = vld [vmem:[%s439_s1] sm:$0xff] }
   0x3   :  { %50 = vmatpush.msra.mxu0 %v17_v0  ;;  %79 = vmatpush.msra.mxu1 %v18_v1  ;;  %v19_v5 = vld [vmem:[%s438_s0] sm:$0xff] }
   0x4   :  { %125 = vmatpush.msra.mxu2 %v15_v2  ;;  %154 = vmatpush.msra.mxu3 %v16_v3 }
   0x5   :  { %290 = vmatmul.msk.f32.vlgmr.msra.gmra.mxu2 %vm23_vm0, %v94_v4  ;;  %294 = vmatmul.msk.f32.vlgmr.msra.gmra.mxu3 %vm23_vm0, %v94_v4 }
   0x6   :  { %8 = vsyncpa [#allocation3], 0  ;;  %51 = vmatpush.msra.mxu0 %v15_v2  ;;  %80 = vmatpush.msra.mxu1 %v16_v3  ;;  %v95_v6 = vld [vmem:[%s439_s1 + $0x8] sm:$0xff]  ;;  %v96_v8 = vld [vmem:[%s439_s1 + $0x10] sm:$0xff]  ;;  %s273_s10 = sshll.u32 %s441_s3, 4  ;;  %s274_s10 = int_to_ptr.hbm [resolvable:$true] %s273_s10 }
   0x7   :  { %282 = vmatmul.msk.f32.vlgmr.msra.gmra.mxu0 %vm23_vm0, %v19_v5  ;;  %286 = vmatmul.msk.f32.vlgmr.msra.gmra.mxu1 %vm23_vm0, %v19_v5  ;;  %v20_v7 = vld [vmem:[%s438_s0 + $0x8] sm:$0xff]  ;;  %v21_v9 = vld [vmem:[%s438_s0 + $0x10] sm:$0xff]  ;;  %v97_v10 = vld [vmem:[%s439_s1 + $0x18] sm:$0xff] }
   0x8   :  { %v22_v11 = vld [vmem:[%s438_s0 + $0x18] sm:$0xff]  ;;  %s333_s0 = smov [#allocation2]  }
   0x9   :  { %s271_s1 = sshll.u32 %s333_s0, 4  ;;  %s272_s1 = int_to_ptr.vmem [resolvable:$true] %s271_s1 }
   0xd   :  { %291 = vmatmul.msk.f32.gmra.mxu2 %vm23_vm0, %v95_v6  ;;  %295 = vmatmul.msk.f32.gmra.mxu3 %vm23_vm0, %v95_v6 }
   0xf   :  { %283 = vmatmul.msk.f32.gmra.mxu0 %vm23_vm0, %v20_v7  ;;  %287 = vmatmul.msk.f32.gmra.mxu1 %vm23_vm0, %v20_v7 }
  0x15   :  { %292 = vmatmul.msk.f32.gmra.mxu2 %vm23_vm0, %v96_v8  ;;  %296 = vmatmul.msk.f32.gmra.mxu3 %vm23_vm0, %v96_v8 }
  0x17   :  { %284 = vmatmul.msk.f32.gmra.mxu0 %vm23_vm0, %v21_v9  ;;  %288 = vmatmul.msk.f32.gmra.mxu1 %vm23_vm0, %v21_v9 }
  0x1d   :  { %293 = vmatmul.msk.f32.gmra.mxu2 %vm23_vm0, %v97_v10  ;;  %297 = vmatmul.msk.f32.gmra.mxu3 %vm23_vm0, %v97_v10 }
  0x1f   :  { %285 = vmatmul.msk.f32.gmra.mxu0 %vm23_vm0, %v22_v11  ;;  %289 = vmatmul.msk.f32.gmra.mxu1 %vm23_vm0, %v22_v11 }
  0x84   :  { %v53_v12 = vpop.f32.mrf.mxu0  ;;  %v82_v13 = vpop.f32.mrf.mxu1 }
  0x85   :  { %v168_v14 = vmul.f32 %v53_v12, %v53_v12  ;;  %v172_v15 = vmul.f32 %v82_v13, %v82_v13 }
  0x87   :  { %v406_v18 = vadd.f32 %v172_v15, %v168_v14 }
  0x88   :  { %v127_v16 = vpop.f32.mrf.mxu2  ;;  %v156_v17 = vpop.f32.mrf.mxu3 }
  0x89   :  { %v180_v19 = vmul.f32 %v127_v16, %v127_v16  ;;  %v184_v20 = vmul.f32 %v156_v17, %v156_v17 }
  0x8b   :  { %v408_v21 = vadd.f32 %v184_v20, %v180_v19 }
  0x8c   :  { %v56_v22 = vpop.f32.mrf.mxu0  ;;  %v85_v23 = vpop.f32.mrf.mxu1 }
  0x8d   :  { %v412_v24 = vmul.f32 %v408_v21, %v406_v18  ;;  %v169_v25 = vmul.f32 %v56_v22, %v56_v22  ;;  %v173_v26 = vmul.f32 %v85_v23, %v85_v23 }
  0x8f   :  { %299 = vrsqrt.f32 %v412_v24  ;;  %v415_v29 = vadd.f32 %v173_v26, %v169_v25  ;;  %vm207_vm2 = vcmp.eq.f32.partialorder %v412_v24, inf  ;;  %v210_v20 = vand.u32 2147483648, %v412_v24 }
  0x90   :  { %v130_v27 = vpop.f32.mrf.mxu2  ;;  %v159_v28 = vpop.f32.mrf.mxu3  ;;  %vm209_vm5 = vcmp.eq.f32.partialorder %v412_v24, 0.0 }
  0x91   :  { %v181_v30 = vmul.f32 %v130_v27, %v130_v27  ;;  %v185_v31 = vmul.f32 %v159_v28, %v159_v28 }
  0x93   :  { %v417_v32 = vadd.f32 %v185_v31, %v181_v30 }
  0x94   :  { %v59_v33 = vpop.f32.mrf.mxu0  ;;  %v88_v34 = vpop.f32.mrf.mxu1 }
  0x95   :  { %v300_v35 = vpop.eup %299  ;;  %v197_v36 = vmul.f32 %v417_v32, %v415_v29  ;;  %v170_v37 = vmul.f32 %v59_v33, %v59_v33  ;;  %v174_v38 = vmul.f32 %v88_v34, %v88_v34  ;;  %v193_v34 = vadd.f32 %v417_v32, %v415_v29 }
  0x96   :  { %v201_v39 = vmul.f32 %v300_v35, %v412_v24 }
  0x97   :  { %301 = vrsqrt.f32 %v197_v36  ;;  %v422_v42 = vadd.f32 %v174_v38, %v170_v37  ;;  %vm219_vm1 = vcmp.eq.f32.partialorder %v197_v36, inf  ;;  %v222_v15 = vand.u32 2147483648, %v197_v36 }
  0x98   :  { %v133_v40 = vpop.f32.mrf.mxu2  ;;  %v162_v41 = vpop.f32.mrf.mxu3  ;;  %v202_v46 = vmul.f32 %v300_v35, %v201_v39  ;;  %vm221_vm3 = vcmp.eq.f32.partialorder %v197_v36, 0.0  ;;  %v192_v37 = vadd.f32 %v408_v21, %v406_v18 }
  0x99   :  { %v182_v43 = vmul.f32 %v133_v40, %v133_v40  ;;  %v186_v44 = vmul.f32 %v162_v41, %v162_v41 }
  0x9a   :  { %v203_v54 = vmul.f32 0.5, %v202_v46 }
  0x9b   :  { %v190_v45 = vadd.f32 %v186_v44, %v182_v43 }
  0x9c   :  { %v62_v47 = vpop.f32.mrf.mxu0  ;;  %v91_v48 = vpop.f32.mrf.mxu1  ;;  %v204_v63 = vsub.f32 1.5, %v203_v54 }
  0x9d   :  { %v302_v49 = vpop.eup %301  ;;  %v198_v50 = vmul.f32 %v190_v45, %v422_v42  ;;  %v171_v51 = vmul.f32 %v62_v47, %v62_v47  ;;  %v175_v52 = vmul.f32 %v91_v48, %v91_v48  ;;  %v194_v39 = vadd.f32 %v190_v45, %v422_v42 }
  0x9e   :  { %v213_v53 = vmul.f32 %v302_v49, %v197_v36  ;;  %v205_v5 = vmul.f32 %v300_v35, %v204_v63 }
  0x9f   :  { %303 = vrsqrt.f32 %v198_v50  ;;  %v179_v58 = vadd.f32 %v175_v52, %v171_v51  ;;  %vm231_vm4 = vcmp.eq.f32.partialorder %v198_v50, inf  ;;  %v234_v23 = vand.u32 2147483648, %v198_v50 }
  0xa0   :  { %v214_v55 = vmul.f32 %v302_v49, %v213_v53  ;;  %v136_v56 = vpop.f32.mrf.mxu2  ;;  %v165_v57 = vpop.f32.mrf.mxu3  ;;  %v206_v9 = vmul.f32 %v205_v5, %v412_v24  ;;  %vm233_vm6 = vcmp.eq.f32.partialorder %v198_v50, 0.0 }
  0xa1   :  { %v183_v59 = vmul.f32 %v136_v56, %v136_v56  ;;  %v187_v60 = vmul.f32 %v165_v57, %v165_v57 }
  0xa2   :  { %v215_v61 = vmul.f32 0.5, %v214_v55  ;;  %v208_v16 = vsel %vm207_vm2, %v412_v24, %v206_v9 }
  0xa3   :  { %v191_v62 = vadd.f32 %v187_v60, %v183_v59  ;;  %v211_v27 = vsel %vm209_vm5, %v210_v20, %v208_v16 }
  0xa4   :  { %v216_v0 = vsub.f32 1.5, %v215_v61  ;;  %v248_v33 = vmul.f32 2.0, %v211_v27 }
  0xa5   :  { %v304_v1 = vpop.eup %303  ;;  %v199_v2 = vmul.f32 %v191_v62, %v179_v58  ;;  %v195_v48 = vadd.f32 %v191_v62, %v179_v58 }
  0xa6   :  { %v217_v3 = vmul.f32 %v302_v49, %v216_v0  ;;  %v225_v4 = vmul.f32 %v304_v1, %v198_v50  ;;  %v252_v41 = vsub.f32 %v192_v37, %v248_v33 }
  0xa7   :  { %305 = vrsqrt.f32 %v199_v2  ;;  %vm243_vm7 = vcmp.eq.f32.partialorder %v199_v2, inf  ;;  %v246_v40 = vand.u32 2147483648, %v199_v2  ;;  %vm245_vm8 = vcmp.eq.f32.partialorder %v199_v2, 0.0 }
  0xa8   :  { %v226_v6 = vmul.f32 %v304_v1, %v225_v4  ;;  %v218_v7 = vmul.f32 %v217_v3, %v197_v36 }
  0xaa   :  { %v227_v8 = vmul.f32 0.5, %v226_v6  ;;  %v220_v12 = vsel %vm219_vm1, %v197_v36, %v218_v7 }
  0xab   :  { %v223_v22 = vsel %vm221_vm3, %v222_v15, %v220_v12 }
  0xac   :  { %v228_v10 = vsub.f32 1.5, %v227_v8  ;;  %v249_v30 = vmul.f32 2.0, %v223_v22 }
  0xad   :  { %v306_v11 = vpop.eup %305 }
  0xae   :  { %v229_v13 = vmul.f32 %v304_v1, %v228_v10  ;;  %v237_v14 = vmul.f32 %v306_v11, %v199_v2  ;;  %v253_v38 = vsub.f32 %v193_v34, %v249_v30 }
  0xb0   :  { %v230_v17 = vmul.f32 %v229_v13, %v198_v50  ;;  %v238_v19 = vmul.f32 %v306_v11, %v237_v14  ;;  %v256_v47 = vadd.f32 %v253_v38, %v252_v41 }
  0xb2   :  { %v232_v25 = vsel %vm231_vm4, %v198_v50, %v230_v17  ;;  %v239_v26 = vmul.f32 0.5, %v238_v19 }
  0xb3   :  { %v235_v28 = vsel %vm233_vm6, %v234_v23, %v232_v25 }
  0xb4   :  { %v240_v31 = vsub.f32 1.5, %v239_v26  ;;  %v250_v35 = vmul.f32 2.0, %v235_v28 }
  0xb6   :  { %v241_v36 = vmul.f32 %v306_v11, %v240_v31  ;;  %v254_v43 = vsub.f32 %v194_v39, %v250_v35 }
  0xb8   :  { %v242_v24 = vmul.f32 %v241_v36, %v199_v2  ;;  %v257_v29 = vadd.f32 %v256_v47, %v254_v43 }
  0xba   :  { %v244_v44 = vsel %vm243_vm7, %v199_v2, %v242_v24 }
  0xbb   :  { %v247_v46 = vsel %vm245_vm8, %v246_v40, %v244_v44 }
  0xbc   :  { %v251_v49 = vmul.f32 2.0, %v247_v46 }
  0xbe   :  { %v255_v32 = vsub.f32 %v195_v48, %v251_v49 }
  0xc0   :  { %v258_v50 = vadd.f32 %v257_v29, %v255_v32 }
  0xc2   :  { %v259_v51 = vrot.slane %v258_v50, 4 }
  0xc4   :  { %v260_v52 = vadd.f32 %v259_v51, %v258_v50 }
  0xc6   :  { %v261_v18 = vrot.slane %v260_v52, 2 }
  0xc8   :  { %v262_v21 = vadd.f32 %v261_v18, %v260_v52 }
  0xca   :  { %v263_v42 = vrot.slane %v262_v21, 1 }
  0xcc   :  { %v264_v45 = vadd.f32 %v263_v42, %v262_v21 }
  0xce   :  { %265 = vst [vmem:[#allocation2] sm:$0x1] %v264_v45 }
  0xcf   :  { %276 = dma.vmem_to_hbm [thread:$0]  %s272_s1, 16, %s274_s10, [#allocation3]  }
  0xd0   :  { %331 = dma.done.wait [#allocation3], 16  }
  0xd1   :  { %332 = vsyncadd [#allocation3], 4294967280 }
  0xd2   :  { %281 = vsyncpa [#allocation3], 1 }

// kernel: tpu_custom_call.1
= control target key start
LH: loop header
LB: loop body
LE: loop exit
PB: predicated region body
PF: predicated region fallthrough
CT: control target
= control target key end

     0   :  { %vm23_vm0 = vcmask 130048   ;;  %s438_s0 = inlined_call_operand.vmem [shape: f32[32,16], index: 0, kind: input, shape index: {}]   ;;  %s439_s1 = inlined_call_operand.vmem [shape: f32[32,16], index: 1, kind: input, shape index: {}]   ;;  %s440_s2 = inlined_call_operand.vmem [shape: f32[16,256], index: 2, kind: input, shape index: {}]   ;;  %s441_s3 = inlined_call_operand.hbm [shape: f32[1,1,128], index: 3, kind: output, shape index: {}]  }
   0x1   :  { %v17_v0 = vld [vmem:[%s440_s2 + $0x10] sm:$0xff]  ;;  %v18_v1 = vld [vmem:[%s440_s2 + $0x18] sm:$0xff]  ;;  %v15_v2 = vld [vmem:[%s440_s2] sm:$0xff] }
   0x2   :  { %124 = vmatpush.msra.mxu2 %v17_v0  ;;  %153 = vmatpush.msra.mxu3 %v18_v1  ;;  %v16_v3 = vld [vmem:[%s440_s2 + $0x8] sm:$0xff]  ;;  %v94_v4 = vld [vmem:[%s439_s1] sm:$0xff] }
   0x3   :  { %50 = vmatpush.msra.mxu0 %v17_v0  ;;  %79 = vmatpush.msra.mxu1 %v18_v1  ;;  %v19_v5 = vld [vmem:[%s438_s0] sm:$0xff] }
   0x4   :  { %125 = vmatpush.msra.mxu2 %v15_v2  ;;  %154 = vmatpush.msra.mxu3 %v16_v3 }
   0x5   :  { %290 = vmatmul.msk.f32.vlgmr.msra.gmra.mxu2 %vm23_vm0, %v94_v4  ;;  %294 = vmatmul.msk.f32.vlgmr.msra.gmra.mxu3 %vm23_vm0, %v94_v4 }
   0x6   :  { %8 = vsyncpa [#allocation3], 0  ;;  %51 = vmatpush.msra.mxu0 %v15_v2  ;;  %80 = vmatpush.msra.mxu1 %v16_v3  ;;  %v95_v6 = vld [vmem:[%s439_s1 + $0x8] sm:$0xff]  ;;  %v96_v8 = vld [vmem:[%s439_s1 + $0x10] sm:$0xff]  ;;  %s273_s10 = sshll.u32 %s441_s3, 4  ;;  %s274_s10 = int_to_ptr.hbm [resolvable:$true] %s273_s10 }
   0x7   :  { %282 = vmatmul.msk.f32.vlgmr.msra.gmra.mxu0 %vm23_vm0, %v19_v5  ;;  %286 = vmatmul.msk.f32.vlgmr.msra.gmra.mxu1 %vm23_vm0, %v19_v5  ;;  %v20_v7 = vld [vmem:[%s438_s0 + $0x8] sm:$0xff]  ;;  %v21_v9 = vld [vmem:[%s438_s0 + $0x10] sm:$0xff]  ;;  %v97_v10 = vld [vmem:[%s439_s1 + $0x18] sm:$0xff] }
   0x8   :  { %v22_v11 = vld [vmem:[%s438_s0 + $0x18] sm:$0xff]  ;;  %s333_s0 = smov [#allocation2]  }
   0x9   :  { %s271_s1 = sshll.u32 %s333_s0, 4  ;;  %s272_s1 = int_to_ptr.vmem [resolvable:$true] %s271_s1 }
   0xd   :  { %291 = vmatmul.msk.f32.gmra.mxu2 %vm23_vm0, %v95_v6  ;;  %295 = vmatmul.msk.f32.gmra.mxu3 %vm23_vm0, %v95_v6 }
   0xf   :  { %283 = vmatmul.msk.f32.gmra.mxu0 %vm23_vm0, %v20_v7  ;;  %287 = vmatmul.msk.f32.gmra.mxu1 %vm23_vm0, %v20_v7 }
  0x15   :  { %292 = vmatmul.msk.f32.gmra.mxu2 %vm23_vm0, %v96_v8  ;;  %296 = vmatmul.msk.f32.gmra.mxu3 %vm23_vm0, %v96_v8 }
  0x17   :  { %284 = vmatmul.msk.f32.gmra.mxu0 %vm23_vm0, %v21_v9  ;;  %288 = vmatmul.msk.f32.gmra.mxu1 %vm23_vm0, %v21_v9 }
  0x1d   :  { %293 = vmatmul.msk.f32.gmra.mxu2 %vm23_vm0, %v97_v10  ;;  %297 = vmatmul.msk.f32.gmra.mxu3 %vm23_vm0, %v97_v10 }
  0x1f   :  { %285 = vmatmul.msk.f32.gmra.mxu0 %vm23_vm0, %v22_v11  ;;  %289 = vmatmul.msk.f32.gmra.mxu1 %vm23_vm0, %v22_v11 }
  0x84   :  { %v53_v12 = vpop.f32.mrf.mxu0  ;;  %v82_v13 = vpop.f32.mrf.mxu1 }
  0x85   :  { %v168_v14 = vmul.f32 %v53_v12, %v53_v12  ;;  %v172_v15 = vmul.f32 %v82_v13, %v82_v13 }
  0x87   :  { %v406_v18 = vadd.f32 %v172_v15, %v168_v14 }
  0x88   :  { %v127_v16 = vpop.f32.mrf.mxu2  ;;  %v156_v17 = vpop.f32.mrf.mxu3 }
  0x89   :  { %v180_v19 = vmul.f32 %v127_v16, %v127_v16  ;;  %v184_v20 = vmul.f32 %v156_v17, %v156_v17 }
  0x8b   :  { %v408_v21 = vadd.f32 %v184_v20, %v180_v19 }
  0x8c   :  { %v56_v22 = vpop.f32.mrf.mxu0  ;;  %v85_v23 = vpop.f32.mrf.mxu1 }
  0x8d   :  { %v412_v24 = vmul.f32 %v408_v21, %v406_v18  ;;  %v169_v25 = vmul.f32 %v56_v22, %v56_v22  ;;  %v173_v26 = vmul.f32 %v85_v23, %v85_v23 }
  0x8f   :  { %299 = vrsqrt.f32 %v412_v24  ;;  %v415_v29 = vadd.f32 %v173_v26, %v169_v25  ;;  %vm207_vm2 = vcmp.eq.f32.partialorder %v412_v24, inf  ;;  %v210_v20 = vand.u32 2147483648, %v412_v24 }
  0x90   :  { %v130_v27 = vpop.f32.mrf.mxu2  ;;  %v159_v28 = vpop.f32.mrf.mxu3  ;;  %vm209_vm5 = vcmp.eq.f32.partialorder %v412_v24, 0.0 }
  0x91   :  { %v181_v30 = vmul.f32 %v130_v27, %v130_v27  ;;  %v185_v31 = vmul.f32 %v159_v28, %v159_v28 }
  0x93   :  { %v417_v32 = vadd.f32 %v185_v31, %v181_v30 }
  0x94   :  { %v59_v33 = vpop.f32.mrf.mxu0  ;;  %v88_v34 = vpop.f32.mrf.mxu1 }
  0x95   :  { %v300_v35 = vpop.eup %299  ;;  %v197_v36 = vmul.f32 %v417_v32, %v415_v29  ;;  %v170_v37 = vmul.f32 %v59_v33, %v59_v33  ;;  %v174_v38 = vmul.f32 %v88_v34, %v88_v34  ;;  %v193_v34 = vadd.f32 %v417_v32, %v415_v29 }
  0x96   :  { %v201_v39 = vmul.f32 %v300_v35, %v412_v24 }
  0x97   :  { %301 = vrsqrt.f32 %v197_v36  ;;  %v422_v42 = vadd.f32 %v174_v38, %v170_v37  ;;  %vm219_vm1 = vcmp.eq.f32.partialorder %v197_v36, inf  ;;  %v222_v15 = vand.u32 2147483648, %v197_v36 }
  0x98   :  { %v133_v40 = vpop.f32.mrf.mxu2  ;;  %v162_v41 = vpop.f32.mrf.mxu3  ;;  %v202_v46 = vmul.f32 %v300_v35, %v201_v39  ;;  %vm221_vm3 = vcmp.eq.f32.partialorder %v197_v36, 0.0  ;;  %v192_v37 = vadd.f32 %v408_v21, %v406_v18 }
  0x99   :  { %v182_v43 = vmul.f32 %v133_v40, %v133_v40  ;;  %v186_v44 = vmul.f32 %v162_v41, %v162_v41 }
  0x9a   :  { %v203_v54 = vmul.f32 0.5, %v202_v46 }
  0x9b   :  { %v190_v45 = vadd.f32 %v186_v44, %v182_v43 }
  0x9c   :  { %v62_v47 = vpop.f32.mrf.mxu0  ;;  %v91_v48 = vpop.f32.mrf.mxu1  ;;  %v204_v63 = vsub.f32 1.5, %v203_v54 }
  0x9d   :  { %v302_v49 = vpop.eup %301  ;;  %v198_v50 = vmul.f32 %v190_v45, %v422_v42  ;;  %v171_v51 = vmul.f32 %v62_v47, %v62_v47  ;;  %v175_v52 = vmul.f32 %v91_v48, %v91_v48  ;;  %v194_v39 = vadd.f32 %v190_v45, %v422_v42 }
  0x9e   :  { %v213_v53 = vmul.f32 %v302_v49, %v197_v36  ;;  %v205_v5 = vmul.f32 %v300_v35, %v204_v63 }
  0x9f   :  { %303 = vrsqrt.f32 %v198_v50  ;;  %v179_v58 = vadd.f32 %v175_v52, %v171_v51  ;;  %vm231_vm4 = vcmp.eq.f32.partialorder %v198_v50, inf  ;;  %v234_v23 = vand.u32 2147483648, %v198_v50 }
  0xa0   :  { %v214_v55 = vmul.f32 %v302_v49, %v213_v53  ;;  %v136_v56 = vpop.f32.mrf.mxu2  ;;  %v165_v57 = vpop.f32.mrf.mxu3  ;;  %v206_v9 = vmul.f32 %v205_v5, %v412_v24  ;;  %vm233_vm6 = vcmp.eq.f32.partialorder %v198_v50, 0.0 }
  0xa1   :  { %v183_v59 = vmul.f32 %v136_v56, %v136_v56  ;;  %v187_v60 = vmul.f32 %v165_v57, %v165_v57 }
  0xa2   :  { %v215_v61 = vmul.f32 0.5, %v214_v55  ;;  %v208_v16 = vsel %vm207_vm2, %v412_v24, %v206_v9 }
  0xa3   :  { %v191_v62 = vadd.f32 %v187_v60, %v183_v59  ;;  %v211_v27 = vsel %vm209_vm5, %v210_v20, %v208_v16 }
  0xa4   :  { %v216_v0 = vsub.f32 1.5, %v215_v61  ;;  %v248_v33 = vmul.f32 2.0, %v211_v27 }
  0xa5   :  { %v304_v1 = vpop.eup %303  ;;  %v199_v2 = vmul.f32 %v191_v62, %v179_v58  ;;  %v195_v48 = vadd.f32 %v191_v62, %v179_v58 }
  0xa6   :  { %v217_v3 = vmul.f32 %v302_v49, %v216_v0  ;;  %v225_v4 = vmul.f32 %v304_v1, %v198_v50  ;;  %v252_v41 = vsub.f32 %v192_v37, %v248_v33 }
  0xa7   :  { %305 = vrsqrt.f32 %v199_v2  ;;  %vm243_vm7 = vcmp.eq.f32.partialorder %v199_v2, inf  ;;  %v246_v40 = vand.u32 2147483648, %v199_v2  ;;  %vm245_vm8 = vcmp.eq.f32.partialorder %v199_v2, 0.0 }
  0xa8   :  { %v226_v6 = vmul.f32 %v304_v1, %v225_v4  ;;  %v218_v7 = vmul.f32 %v217_v3, %v197_v36 }
  0xaa   :  { %v227_v8 = vmul.f32 0.5, %v226_v6  ;;  %v220_v12 = vsel %vm219_vm1, %v197_v36, %v218_v7 }
  0xab   :  { %v223_v22 = vsel %vm221_vm3, %v222_v15, %v220_v12 }
  0xac   :  { %v228_v10 = vsub.f32 1.5, %v227_v8  ;;  %v249_v30 = vmul.f32 2.0, %v223_v22 }
  0xad   :  { %v306_v11 = vpop.eup %305 }
  0xae   :  { %v229_v13 = vmul.f32 %v304_v1, %v228_v10  ;;  %v237_v14 = vmul.f32 %v306_v11, %v199_v2  ;;  %v253_v38 = vsub.f32 %v193_v34, %v249_v30 }
  0xb0   :  { %v230_v17 = vmul.f32 %v229_v13, %v198_v50  ;;  %v238_v19 = vmul.f32 %v306_v11, %v237_v14  ;;  %v256_v47 = vadd.f32 %v253_v38, %v252_v41 }
  0xb2   :  { %v232_v25 = vsel %vm231_vm4, %v198_v50, %v230_v17  ;;  %v239_v26 = vmul.f32 0.5, %v238_v19 }
  0xb3   :  { %v235_v28 = vsel %vm233_vm6, %v234_v23, %v232_v25 }
  0xb4   :  { %v240_v31 = vsub.f32 1.5, %v239_v26  ;;  %v250_v35 = vmul.f32 2.0, %v235_v28 }
  0xb6   :  { %v241_v36 = vmul.f32 %v306_v11, %v240_v31  ;;  %v254_v43 = vsub.f32 %v194_v39, %v250_v35 }
  0xb8   :  { %v242_v24 = vmul.f32 %v241_v36, %v199_v2  ;;  %v257_v29 = vadd.f32 %v256_v47, %v254_v43 }
  0xba   :  { %v244_v44 = vsel %vm243_vm7, %v199_v2, %v242_v24 }
  0xbb   :  { %v247_v46 = vsel %vm245_vm8, %v246_v40, %v244_v44 }
  0xbc   :  { %v251_v49 = vmul.f32 2.0, %v247_v46 }
  0xbe   :  { %v255_v32 = vsub.f32 %v195_v48, %v251_v49 }
  0xc0   :  { %v258_v50 = vadd.f32 %v257_v29, %v255_v32 }
  0xc2   :  { %v259_v51 = vrot.slane %v258_v50, 4 }
  0xc4   :  { %v260_v52 = vadd.f32 %v259_v51, %v258_v50 }
  0xc6   :  { %v261_v18 = vrot.slane %v260_v52, 2 }
  0xc8   :  { %v262_v21 = vadd.f32 %v261_v18, %v260_v52 }
  0xca   :  { %v263_v42 = vrot.slane %v262_v21, 1 }
  0xcc   :  { %v264_v45 = vadd.f32 %v263_v42, %v262_v21 }
  0xce   :  { %265 = vst [vmem:[#allocation2] sm:$0x1] %v264_v45 }
  0xcf   :  { %276 = dma.vmem_to_hbm [thread:$0]  %s272_s1, 16, %s274_s10, [#allocation3]  }
  0xd0   :  { %331 = dma.done.wait [#allocation3], 16  }
  0xd1   :  { %332 = vsyncadd [#allocation3], 4294967280 }
  0xd2   :  { %281 = vsyncpa [#allocation3], 1 }

</bundles_post_ra>
